<compile_context>
chip_gen: v5e
topology: v5e:2x2
jax: 0.10.0
libtpu: 0.0.40
codegen_flags: <defaults>
</compile_context>

<pallas_src>
import jax
import jax.numpy as jnp
import numpy as np
from jax.experimental import pallas as pl
from jax.experimental.pallas import tpu as pltpu

# ---- config (small, consistent with the module; lane-dense dims) -------------
BATCH = 2
SEQ = 16
HIDDEN = 128            # config.hidden_size
INTERMEDIATE = 256      # config.intermediate_size


# ---- Pallas kernel ------------------------------------------------------------
def mlp_kernel(x_ref, wgu_ref, wd_ref, o_ref):
    # Cast activations to bf16 at the MXU boundary (in-kernel VPU op, no extra
    # HBM pass on the host side).
    x = x_ref[...].astype(jnp.bfloat16)        # (M, HIDDEN)
    wgu = wgu_ref[...]                         # (HIDDEN, 2*INTER)  bf16, gate|up fused
    wd = wd_ref[...]                           # (INTER, HIDDEN)    bf16

    # One fused projection for gate and up (single wide MXU dot, f32 accumulation).
    gu = jnp.dot(x, wgu, preferred_element_type=jnp.float32)   # (M, 2*INTER) f32
    gate = gu[:, :INTERMEDIATE]                                # static 128-aligned slices
    up = gu[:, INTERMEDIATE:]

    # SiLU(gate) * up in fp32 (sigmoid lowers to the otherwise-idle EUP slot).
    h = (jax.nn.silu(gate) * up).astype(jnp.bfloat16)          # (M, INTER) bf16

    # Down projection; output last dim = HIDDEN = 128 -> lane-dense store.
    o_ref[...] = jnp.dot(h, wd, preferred_element_type=jnp.float32).astype(o_ref.dtype)


@jax.jit
def mlp_forward(x, wgu, wd_bf16):
    """x: (B, S, HIDDEN) fp32.  wgu: (HIDDEN, 2*INTER) bf16 (precomputed gate|up).
    wd_bf16: (INTER, HIDDEN) bf16 (precomputed).  Returns (B, S, HIDDEN) bf16."""
    B, S, H = x.shape
    M = B * S
    I2 = wgu.shape[1]
    I = wd_bf16.shape[0]

    x2 = x.reshape(M, H)   # tokens are independent in an MLP; folded by jit

    flops = 2 * M * H * I2 + 2 * M * I * H
    bytes_accessed = (M * H * 4            # x fp32 in
                      + H * I2 * 2         # wgu bf16
                      + I * H * 2          # wd bf16
                      + M * H * 2)         # out bf16
    cost = pl.CostEstimate(flops=flops, transcendentals=M * I,
                           bytes_accessed=bytes_accessed)

    out = pl.pallas_call(
        mlp_kernel,
        out_shape=jax.ShapeDtypeStruct((M, H), jnp.bfloat16),
        # No grid: single invocation, whole arrays resident in VMEM (toy size).
        in_specs=[
            pl.BlockSpec(memory_space=pltpu.MemorySpace.VMEM),
            pl.BlockSpec(memory_space=pltpu.MemorySpace.VMEM),
            pl.BlockSpec(memory_space=pltpu.MemorySpace.VMEM),
        ],
        out_specs=pl.BlockSpec(memory_space=pltpu.MemorySpace.VMEM),
        cost_estimate=cost,
    )(x2, wgu, wd_bf16)
    return out.reshape(B, S, H)


# ---- "module init": fuse + cast the weights once, outside the forward path ----
def prepare_weights(wg, wu, wd):
    """wg/wu: (HIDDEN, INTER), wd: (INTER, HIDDEN) — already W.T of nn.Linear."""
    wgu = jnp.concatenate([wg, wu], axis=1).astype(jnp.bfloat16)   # (H, 2*INTER)
    wd_bf16 = wd.astype(jnp.bfloat16)                              # (INTER, H)
    return wgu, wd_bf16


# ---- pure-JAX reference (mirrors the PyTorch forward, fp32) -------------------
def ref_forward(x, wg, wu, wd):
    gate = jax.nn.silu(x @ wg)
    up = x @ wu
    return (gate * up) @ wd


# ---- deterministic parameters / inputs ----------------------------------------
if __name__ == "__main__":
    key = jax.random.PRNGKey(0)
    kx, kg, ku, kd = jax.random.split(key, 4)

    x = jax.random.normal(kx, (BATCH, SEQ, HIDDEN), dtype=jnp.float32)
    # nn.Linear(in, out, bias=False): weight is (out, in); we store W.T = (in, out)
    wg = 0.02 * jax.random.normal(kg, (HIDDEN, INTERMEDIATE), dtype=jnp.float32)
    wu = 0.02 * jax.random.normal(ku, (HIDDEN, INTERMEDIATE), dtype=jnp.float32)
    wd = 0.02 * jax.random.normal(kd, (INTERMEDIATE, HIDDEN), dtype=jnp.float32)

    wgu, wd_bf16 = prepare_weights(wg, wu, wd)

    out = mlp_forward(x, wgu, wd_bf16)
    out = jax.block_until_ready(out)

    expected = ref_forward(x, wg, wu, wd)
    # bf16 MXU operands / bf16 output (f32 accumulation) -> loosened tolerance
    # vs the fp32 reference.
    np.testing.assert_allclose(np.asarray(out, dtype=np.float32),
                               np.asarray(expected),
                               rtol=2e-2, atol=5e-3)

    print("KERNEL_OK")
</pallas_src>

<mosaic_0001>
module attributes {stable_mosaic.version = 11 : i64} {
  func.func @mlp_kernel(%arg0: memref<32x128xf32, #tpu.memory_space<vmem>>, %arg1: memref<128x512xbf16, #tpu.memory_space<vmem>>, %arg2: memref<256x128xbf16, #tpu.memory_space<vmem>>, %arg3: memref<32x128xbf16, #tpu.memory_space<vmem>>) attributes {dimension_semantics = [], scalar_prefetch = 0 : i64, scratch_operands = 0 : i64, tpu.core_type = #tpu.core_type<tc>} {
    %c0 = arith.constant 0 : index
    %c0_0 = arith.constant 0 : index
    %0 = vector.load %arg0[%c0, %c0_0] : memref<32x128xf32, #tpu.memory_space<vmem>>, vector<32x128xf32>
    %1 = arith.truncf %0 : vector<32x128xf32> to vector<32x128xbf16>
    %c0_1 = arith.constant 0 : index
    %c0_2 = arith.constant 0 : index
    %2 = vector.load %arg1[%c0_1, %c0_2] : memref<128x512xbf16, #tpu.memory_space<vmem>>, vector<128x512xbf16>
    %c0_3 = arith.constant 0 : index
    %c0_4 = arith.constant 0 : index
    %3 = vector.load %arg2[%c0_3, %c0_4] : memref<256x128xbf16, #tpu.memory_space<vmem>>, vector<256x128xbf16>
    %cst = arith.constant dense<0.000000e+00> : vector<32x512xf32>
    %4 = tpu.matmul %1, %2, %cst {dimension_numbers = #tpu.dot_dimension_numbers<[1], [0], [0], [1], [0, 0, 1, 1], [], []>} : vector<32x128xbf16>, vector<128x512xbf16>, vector<32x512xf32> -> vector<32x512xf32>
    %5 = vector.extract_strided_slice %4 {offsets = [0, 0], sizes = [32, 256], strides = [1, 1]} : vector<32x512xf32> to vector<32x256xf32>
    %6 = vector.extract_strided_slice %4 {offsets = [0, 256], sizes = [32, 256], strides = [1, 1]} : vector<32x512xf32> to vector<32x256xf32>
    %7 = arith.negf %5 : vector<32x256xf32>
    %8 = math.exp %7 : vector<32x256xf32>
    %cst_5 = arith.constant 1.000000e+00 : f32
    %9 = vector.broadcast %cst_5 : f32 to vector<32x256xf32>
    %10 = arith.addf %9, %8 : vector<32x256xf32>
    %11 = arith.divf %9, %10 : vector<32x256xf32>
    %12 = arith.mulf %5, %11 : vector<32x256xf32>
    %13 = arith.mulf %12, %6 : vector<32x256xf32>
    %14 = arith.truncf %13 : vector<32x256xf32> to vector<32x256xbf16>
    %cst_6 = arith.constant dense<0.000000e+00> : vector<32x128xf32>
    %15 = tpu.matmul %14, %3, %cst_6 {dimension_numbers = #tpu.dot_dimension_numbers<[1], [0], [0], [1], [0, 0, 1, 1], [], []>} : vector<32x256xbf16>, vector<256x128xbf16>, vector<32x128xf32> -> vector<32x128xf32>
    %16 = arith.truncf %15 : vector<32x128xf32> to vector<32x128xbf16>
    %c0_7 = arith.constant 0 : index
    %c0_8 = arith.constant 0 : index
    %17 = vector.load %arg3[%c0_7, %c0_8] : memref<32x128xbf16, #tpu.memory_space<vmem>>, vector<32x128xbf16>
    tpu.vector_store %arg3[%c0_7, %c0_8], %16 {strides = array<i32>} : memref<32x128xbf16, #tpu.memory_space<vmem>>, vector<32x128xbf16>,
    return
  }
}

</mosaic_0001>

<bundles_post_ra>
// kernel: mlp_forward.1
= control target key start
LH: loop header
LB: loop body
LE: loop exit
PB: predicated region body
PF: predicated region fallthrough
CT: control target
= control target key end

     0   :  { %8 = vsyncpa [#allocation3], 0  ;;  %s1314_s0 = inlined_call_operand.hbm [shape: f32[32,128], index: 0, kind: input, shape index: {}]   ;;  %s1315_s1 = inlined_call_operand.hbm [shape: bf16[128,512], index: 1, kind: input, shape index: {}]   ;;  %s1316_s2 = inlined_call_operand.hbm [shape: bf16[256,128], index: 2, kind: input, shape index: {}]   ;;  %s1317_s3 = inlined_call_operand.hbm [shape: bf16[32,128], index: 3, kind: output, shape index: {}]  }
   0x1   :  { %9 = vsyncpa [#allocation6], 0  ;;  %s28_s14 = sshll.u32 %s1315_s1, 4  ;;  %s29_s14 = int_to_ptr.hbm [resolvable:$true] %s28_s14 }
   0x2   :  { %10 = vsyncpa [#allocation4], 0  ;;  %s1121_s15 = smov [#allocation5]   ;;  %s15_s19 = sshll.u32 %s1314_s0, 4  ;;  %s16_s19 = int_to_ptr.hbm [resolvable:$true] %s15_s19 }
   0x3   :  { %s30_s16 = sshll.u32 %s1121_s15, 4  ;;  %s1122_s20 = smov 256   ;;  %s31_s16 = int_to_ptr.vmem [resolvable:$true] %s30_s16 }
   0x4   :  { %s1123_s21 = smov 16   ;;  %s1124_s22 = smov [#allocation2]  }
   0x5   :  { %36 = dma.hbm_to_vmem [thread:$0]  %s29_s14, 4096, %s31_s16, [#allocation6], %s1122_s20, %s1122_s20, %s1123_s21  }
   0x6   :  { %s17_s23 = sshll.u32 %s1124_s22, 4  ;;  %s1125_s24 = smov 128   ;;  %s18_s23 = int_to_ptr.vmem [resolvable:$true] %s17_s23 }
   0x7   :  { %s1126_s25 = smov 8   ;;  %s41_s27 = sshll.u32 %s1316_s2, 4  ;;  %s42_s27 = int_to_ptr.hbm [resolvable:$true] %s41_s27 }
   0x8   :  { %23 = dma.hbm_to_vmem [thread:$0]  %s16_s19, 512, %s18_s23, [#allocation3], %s1125_s24, %s1125_s24, %s1126_s25  }
   0x9   :  { %s1127_s28 = smov [#allocation7]   ;;  %s1128_s30 = smov 64  }
   0xa   :  { %s43_s29 = sshll.u32 %s1127_s28, 4  ;;  %s1129_s0 = smov 4   ;;  %s44_s29 = int_to_ptr.vmem [resolvable:$true] %s43_s29 }
   0xb   :  { %49 = dma.hbm_to_vmem [thread:$0]  %s42_s27, 2048, %s44_s29, [#allocation6], %s1128_s30, %s1128_s30, %s1129_s0  }
   0xc   :  { %1115 = dma.done.wait [#allocation3], 512  }
   0xd   :  { %1116 = vsyncadd [#allocation3], 4294966784 }
   0xe   :  { %1117 = dma.done.wait [#allocation6], 6144  }
   0xf   :  { %1118 = vsyncadd [#allocation6], 4294961152  ;;  %v816_v0 = vld [vmem:[#allocation5 + $0xe0] sm:$0xf]  ;;  %v932_v1 = vld [vmem:[#allocation5 + $0xec] sm:$0xf0] }
  0x10   :  { %v930_v2 = vld [vmem:[#allocation5 + $0xe4] sm:$0xf]  ;;  %v817_v3 = vor.u32 %v932_v1, %v816_v0  ;;  %v818_v4 = vld [vmem:[#allocation5 + $0xf0] sm:$0xf0]  ;;  %v800_v5 = vld [vmem:[#allocation5 + $0xc0] sm:$0xf] }
  0x11   :  { %v928_v6 = vld [vmem:[#allocation5 + $0xcc] sm:$0xf0]  ;;  %v821_v7 = vor.u32 %v930_v2, %v818_v4  ;;  %v926_v8 = vld [vmem:[#allocation5 + $0xc4] sm:$0xf]  ;;  %v802_v9 = vld [vmem:[#allocation5 + $0xd0] sm:$0xf0] }
  0x12   :  { %292 = vmatpush.bf16.msra.mxu0 %v817_v3  ;;  %v801_v10 = vor.u32 %v928_v6, %v800_v5  ;;  %v805_v11 = vor.u32 %v926_v8, %v802_v9  ;;  %v784_v12 = vld [vmem:[#allocation5 + $0xa0] sm:$0xf]  ;;  %v924_v13 = vld [vmem:[#allocation5 + $0xac] sm:$0xf0]  ;;  %v922_v14 = vld [vmem:[#allocation5 + $0xa4] sm:$0xf] }
  0x13   :  { %311 = vmatpush.bf16.msra.mxu1 %v821_v7  ;;  %v786_v15 = vld [vmem:[#allocation5 + $0xb0] sm:$0xf0]  ;;  %v824_v16 = vld [vmem:[#allocation5 + $0xe8] sm:$0xf]  ;;  %v785_v17 = vor.u32 %v924_v13, %v784_v12  ;;  %v933_v18 = vld [vmem:[#allocation5 + $0xf4] sm:$0xf0] }
  0x14   :  { %v931_v19 = vld [vmem:[#allocation5 + $0xec] sm:$0xf]  ;;  %v826_v20 = vld [vmem:[#allocation5 + $0xf8] sm:$0xf0]  ;;  %v789_v21 = vor.u32 %v922_v14, %v786_v15  ;;  %v768_v22 = vld [vmem:[#allocation5 + $0x80] sm:$0xf]  ;;  %v825_v25 = vor.u32 %v933_v18, %v824_v16 }
  0x15   :  { %v920_v23 = vld [vmem:[#allocation5 + $0x8c] sm:$0xf0]  ;;  %v918_v24 = vld [vmem:[#allocation5 + $0x84] sm:$0xf]  ;;  %v829_v26 = vor.u32 %v931_v19, %v826_v20  ;;  %v770_v27 = vld [vmem:[#allocation5 + $0x90] sm:$0xf0] }
  0x16   :  { %293 = vmatpush.bf16.msra.mxu0 %v801_v10  ;;  %v808_v28 = vld [vmem:[#allocation5 + $0xc8] sm:$0xf]  ;;  %v929_v29 = vld [vmem:[#allocation5 + $0xd4] sm:$0xf0]  ;;  %330 = vmatpush.bf16.msra.mxu2 %v825_v25  ;;  %v927_v31 = vld [vmem:[#allocation5 + $0xcc] sm:$0xf]  ;;  %v769_v33 = vor.u32 %v920_v23, %v768_v22  ;;  %v773_v37 = vor.u32 %v918_v24, %v770_v27 }
  0x17   :  { %312 = vmatpush.bf16.msra.mxu1 %v805_v11  ;;  %349 = vmatpush.bf16.msra.mxu3 %v829_v26  ;;  %v809_v30 = vor.u32 %v929_v29, %v808_v28  ;;  %v810_v32 = vld [vmem:[#allocation5 + $0xd8] sm:$0xf0]  ;;  %v752_v34 = vld [vmem:[#allocation5 + $0x60] sm:$0xf]  ;;  %v916_v35 = vld [vmem:[#allocation5 + $0x6c] sm:$0xf0] }
  0x18   :  { %v813_v36 = vor.u32 %v927_v31, %v810_v32  ;;  %v792_v38 = vld [vmem:[#allocation5 + $0xa8] sm:$0xf]  ;;  %v925_v39 = vld [vmem:[#allocation5 + $0xb4] sm:$0xf0]  ;;  %v923_v40 = vld [vmem:[#allocation5 + $0xac] sm:$0xf]  ;;  %v753_v47 = vor.u32 %v916_v35, %v752_v34 }
  0x19   :  { %v914_v41 = vld [vmem:[#allocation5 + $0x64] sm:$0xf]  ;;  %v754_v42 = vld [vmem:[#allocation5 + $0x70] sm:$0xf0]  ;;  %v794_v43 = vld [vmem:[#allocation5 + $0xb8] sm:$0xf0]  ;;  %v793_v44 = vor.u32 %v925_v39, %v792_v38 }
  0x1a   :  { %294 = vmatpush.bf16.msra.mxu0 %v785_v17  ;;  %331 = vmatpush.bf16.msra.mxu2 %v809_v30  ;;  %v797_v45 = vor.u32 %v923_v40, %v794_v43  ;;  %v776_v46 = vld [vmem:[#allocation5 + $0x88] sm:$0xf]  ;;  %v921_v48 = vld [vmem:[#allocation5 + $0x94] sm:$0xf0]  ;;  %v919_v49 = vld [vmem:[#allocation5 + $0x8c] sm:$0xf]  ;;  %v757_v51 = vor.u32 %v914_v41, %v754_v42 }
  0x1b   :  { %313 = vmatpush.bf16.msra.mxu1 %v789_v21  ;;  %350 = vmatpush.bf16.msra.mxu3 %v813_v36  ;;  %v778_v50 = vld [vmem:[#allocation5 + $0x98] sm:$0xf0]  ;;  %v736_v52 = vld [vmem:[#allocation5 + $0x40] sm:$0xf]  ;;  %v912_v53 = vld [vmem:[#allocation5 + $0x4c] sm:$0xf0]  ;;  %v777_v56 = vor.u32 %v921_v48, %v776_v46 }
  0x1c   :  { %v910_v54 = vld [vmem:[#allocation5 + $0x44] sm:$0xf]  ;;  %v738_v55 = vld [vmem:[#allocation5 + $0x50] sm:$0xf0]  ;;  %v781_v57 = vor.u32 %v919_v49, %v778_v50  ;;  %v760_v58 = vld [vmem:[#allocation5 + $0x68] sm:$0xf]  ;;  %v737_v59 = vor.u32 %v912_v53, %v736_v52 }
  0x1d   :  { %v917_v60 = vld [vmem:[#allocation5 + $0x74] sm:$0xf0]  ;;  %v915_v61 = vld [vmem:[#allocation5 + $0x6c] sm:$0xf]  ;;  %v762_v62 = vld [vmem:[#allocation5 + $0x78] sm:$0xf0]  ;;  %v741_v63 = vor.u32 %v910_v54, %v738_v55 }
  0x1e   :  { %295 = vmatpush.bf16.msra.mxu0 %v769_v33  ;;  %332 = vmatpush.bf16.msra.mxu2 %v793_v44  ;;  %v720_v0 = vld [vmem:[#allocation5 + $0x20] sm:$0xf]  ;;  %v908_v1 = vld [vmem:[#allocation5 + $0x2c] sm:$0xf0]  ;;  %v906_v2 = vld [vmem:[#allocation5 + $0x24] sm:$0xf]  ;;  %v761_v4 = vor.u32 %v917_v60, %v760_v58  ;;  %v765_v5 = vor.u32 %v915_v61, %v762_v62 }
  0x1f   :  { %314 = vmatpush.bf16.msra.mxu1 %v773_v37  ;;  %351 = vmatpush.bf16.msra.mxu3 %v797_v45  ;;  %v722_v3 = vld [vmem:[#allocation5 + $0x30] sm:$0xf0]  ;;  %v744_v6 = vld [vmem:[#allocation5 + $0x48] sm:$0xf]  ;;  %v721_v7 = vor.u32 %v908_v1, %v720_v0  ;;  %v913_v8 = vld [vmem:[#allocation5 + $0x54] sm:$0xf0] }
  0x20   :  { %v911_v9 = vld [vmem:[#allocation5 + $0x4c] sm:$0xf]  ;;  %v746_v10 = vld [vmem:[#allocation5 + $0x58] sm:$0xf0]  ;;  %v725_v11 = vor.u32 %v906_v2, %v722_v3  ;;  %v704_v12 = vld [vmem:[#allocation5] sm:$0xf]  ;;  %v745_v17 = vor.u32 %v913_v8, %v744_v6 }
  0x21   :  { %v904_v13 = vld [vmem:[#allocation5 + $0xc] sm:$0xf0]  ;;  %v902_v14 = vld [vmem:[#allocation5 + $0x4] sm:$0xf]  ;;  %v706_v15 = vld [vmem:[#allocation5 + $0x10] sm:$0xf0]  ;;  %v749_v18 = vor.u32 %v911_v9, %v746_v10 }
  0x22   :  { %296 = vmatpush.bf16.msra.mxu0 %v753_v47  ;;  %333 = vmatpush.bf16.msra.mxu2 %v777_v56  ;;  %v62_v16 = vld [vmem:[#allocation2] sm:$0xff]  ;;  %v705_v19 = vor.u32 %v904_v13, %v704_v12  ;;  %v63_v20 = vld [vmem:[#allocation2 + $0x8] sm:$0xff]  ;;  %v909_v22 = vld [vmem:[#allocation5 + $0x34] sm:$0xf0]  ;;  %v709_v23 = vor.u32 %v902_v14, %v706_v15  ;;  %s1130_s2 = smov [#allocation8]   ;;  %s688_s7 = sshll.u32 %s1317_s3, 4  ;;  %s689_s7 = int_to_ptr.hbm [resolvable:$true] %s688_s7 }
  0x23   :  { %315 = vmatpush.bf16.msra.mxu1 %v757_v51  ;;  %352 = vmatpush.bf16.msra.mxu3 %v781_v57  ;;  %v728_v21 = vld [vmem:[#allocation5 + $0x28] sm:$0xf]  ;;  %v907_v24 = vld [vmem:[#allocation5 + $0x2c] sm:$0xf]  ;;  %v730_v25 = vld [vmem:[#allocation5 + $0x38] sm:$0xf0]  ;;  %v66_v26 = vpack.c.bf16 %v63_v20, %v62_v16 }
  0x24   :  { %v729_v27 = vor.u32 %v909_v22, %v728_v21  ;;  %v733_v28 = vor.u32 %v907_v24, %v730_v25  ;;  %v712_v29 = vld [vmem:[#allocation5 + $0x8] sm:$0xf]  ;;  %v905_v30 = vld [vmem:[#allocation5 + $0x14] sm:$0xf0]  ;;  %v903_v31 = vld [vmem:[#allocation5 + $0xc] sm:$0xf] }
  0x25   :  { %v714_v32 = vld [vmem:[#allocation5 + $0x18] sm:$0xf0]  ;;  %v713_v33 = vor.u32 %v905_v30, %v712_v29  ;;  %v64_v35 = vld [vmem:[#allocation2 + $0x10] sm:$0xff]  ;;  %v939_v42 = vld [vmem:[#allocation7 + $0x28] sm:$0xff]  ;;  %s686_s4 = sshll.u32 %s1130_s2, 4  ;;  %s687_s4 = int_to_ptr.vmem [resolvable:$true] %s686_s4 }
  0x26   :  { %297 = vmatpush.bf16.msra.mxu0 %v737_v59  ;;  %334 = vmatpush.bf16.msra.mxu2 %v761_v4  ;;  %v717_v34 = vor.u32 %v903_v31, %v714_v32  ;;  %v65_v36 = vld [vmem:[#allocation2 + $0x18] sm:$0xff]  ;;  %v940_v40 = vld [vmem:[#allocation7 + $0x30] sm:$0xff]  ;;  %v947_v43 = vld [vmem:[#allocation7 + $0x68] sm:$0xff] }
  0x27   :  { %316 = vmatpush.bf16.msra.mxu1 %v741_v63  ;;  %353 = vmatpush.bf16.msra.mxu3 %v765_v5  ;;  %v67_v37 = vpack.c.bf16 %v65_v36, %v64_v35  ;;  %v941_v38 = vld [vmem:[#allocation7 + $0x38] sm:$0xff]  ;;  %v948_v41 = vld [vmem:[#allocation7 + $0x70] sm:$0xff]  ;;  %v938_v44 = vld [vmem:[#allocation7 + $0x20] sm:$0xff] }
  0x28   :  { %v949_v39 = vld [vmem:[#allocation7 + $0x78] sm:$0xff]  ;;  %v946_v45 = vld [vmem:[#allocation7 + $0x60] sm:$0xff]  ;;  %v936_v52 = vld [vmem:[#allocation7 + $0x10] sm:$0xff] }
  0x29   :  { %v937_v50 = vld [vmem:[#allocation7 + $0x18] sm:$0xff]  ;;  %v944_v53 = vld [vmem:[#allocation7 + $0x50] sm:$0xff]  ;;  %v935_v62 = vld [vmem:[#allocation7 + $0x8] sm:$0xff] }
  0x2a   :  { %298 = vmatpush.bf16.msra.mxu0 %v721_v7  ;;  %335 = vmatpush.bf16.msra.mxu2 %v745_v17  ;;  %v945_v51 = vld [vmem:[#allocation7 + $0x58] sm:$0xff]  ;;  %v943_v63 = vld [vmem:[#allocation7 + $0x48] sm:$0xff]  ;;  %v934_v0 = vld [vmem:[#allocation7] sm:$0xff] }
  0x2b   :  { %317 = vmatpush.bf16.msra.mxu1 %v725_v11  ;;  %354 = vmatpush.bf16.msra.mxu3 %v749_v18  ;;  %v942_v1 = vld [vmem:[#allocation7 + $0x40] sm:$0xff] }
  0x2e   :  { %299 = vmatpush.bf16.msra.mxu0 %v705_v19  ;;  %336 = vmatpush.bf16.msra.mxu2 %v729_v27 }
  0x2f   :  { %318 = vmatpush.bf16.msra.mxu1 %v709_v23  ;;  %355 = vmatpush.bf16.msra.mxu3 %v733_v28 }
  0x31   :  { %300 = vmatmul.bf16.vlgmr.msra.gmra.mxu0 %v66_v26 }
  0x32   :  { %319 = vmatmul.bf16.vlgmr.msra.gmra.mxu1 %v66_v26  ;;  %337 = vmatpush.bf16.msra.mxu2 %v713_v33 }
  0x33   :  { %356 = vmatpush.bf16.msra.mxu3 %v717_v34  ;;  %636 = vmatpush.bf16.msrb.mxu0 %v941_v38 }
  0x34   :  { %655 = vmatpush.bf16.msrb.mxu1 %v949_v39 }
  0x35   :  { %338 = vmatmul.bf16.vlgmr.msra.gmra.mxu2 %v66_v26 }
  0x36   :  { %357 = vmatmul.bf16.vlgmr.msra.gmra.mxu3 %v66_v26  ;;  %961 = vmatpush.bf16.msrb.mxu2 %v941_v38 }
  0x37   :  { %969 = vmatpush.bf16.msrb.mxu3 %v949_v39  ;;  %637 = vmatpush.bf16.msrb.mxu0 %v940_v40 }
  0x38   :  { %656 = vmatpush.bf16.msrb.mxu1 %v948_v41 }
  0x3a   :  { %962 = vmatpush.bf16.msrb.mxu2 %v940_v40 }
  0x3b   :  { %970 = vmatpush.bf16.msrb.mxu3 %v948_v41  ;;  %638 = vmatpush.bf16.msrb.mxu0 %v939_v42 }
  0x3c   :  { %657 = vmatpush.bf16.msrb.mxu1 %v947_v43 }
  0x3e   :  { %963 = vmatpush.bf16.msrb.mxu2 %v939_v42 }
  0x3f   :  { %971 = vmatpush.bf16.msrb.mxu3 %v947_v43  ;;  %639 = vmatpush.bf16.msrb.mxu0 %v938_v44 }
  0x40   :  { %658 = vmatpush.bf16.msrb.mxu1 %v946_v45 }
  0x41   :  { %305 = vmatmul.bf16.gmra.mxu0 %v67_v37 }
  0x42   :  { %324 = vmatmul.bf16.gmra.mxu1 %v67_v37  ;;  %964 = vmatpush.bf16.msrb.mxu2 %v938_v44 }
  0x43   :  { %972 = vmatpush.bf16.msrb.mxu3 %v946_v45  ;;  %640 = vmatpush.bf16.msrb.mxu0 %v937_v50 }
  0x44   :  { %659 = vmatpush.bf16.msrb.mxu1 %v945_v51 }
  0x45   :  { %343 = vmatmul.bf16.gmra.mxu2 %v67_v37 }
  0x46   :  { %362 = vmatmul.bf16.gmra.mxu3 %v67_v37  ;;  %965 = vmatpush.bf16.msrb.mxu2 %v937_v50 }
  0x47   :  { %973 = vmatpush.bf16.msrb.mxu3 %v945_v51  ;;  %641 = vmatpush.bf16.msrb.mxu0 %v936_v52 }
  0x48   :  { %660 = vmatpush.bf16.msrb.mxu1 %v944_v53 }
  0x4a   :  { %966 = vmatpush.bf16.msrb.mxu2 %v936_v52 }
  0x4b   :  { %974 = vmatpush.bf16.msrb.mxu3 %v944_v53  ;;  %642 = vmatpush.bf16.msrb.mxu0 %v935_v62 }
  0x4c   :  { %661 = vmatpush.bf16.msrb.mxu1 %v943_v63 }
  0x4e   :  { %967 = vmatpush.bf16.msrb.mxu2 %v935_v62 }
  0x4f   :  { %975 = vmatpush.bf16.msrb.mxu3 %v943_v63  ;;  %643 = vmatpush.bf16.msrb.mxu0 %v934_v0 }
  0x50   :  { %662 = vmatpush.bf16.msrb.mxu1 %v942_v1 }
  0x52   :  { %968 = vmatpush.bf16.msrb.mxu2 %v934_v0 }
  0x53   :  { %976 = vmatpush.bf16.msrb.mxu3 %v942_v1 }
  0xae   :  { %v1163_v46 = vpop.f32.mrf.mxu0 }
  0xaf   :  { %v830_v47 = vmul.f32 -1.442695, %v1163_v46  ;;  %v1166_v48 = vpop.f32.mrf.mxu1 }
  0xb0   :  { %v831_v49 = vmul.f32 -1.442695, %v1166_v48 }
  0xb1   :  { %987 = vpow2.f32 %v830_v47 }
  0xb2   :  { %989 = vpow2.f32 %v831_v49 }
  0xb6   :  { %v1169_v54 = vpop.f32.mrf.mxu0 }
  0xb7   :  { %v988_v55 = vpop.eup %987  ;;  %v832_v56 = vmul.f32 -1.442695, %v1169_v54  ;;  %v1172_v57 = vpop.f32.mrf.mxu1 }
  0xb8   :  { %v990_v58 = vpop.eup %989  ;;  %v1174_v59 = vadd.f32 1.0, %v988_v55  ;;  %v833_v60 = vmul.f32 -1.442695, %v1172_v57  ;;  %v1201_v20 = vpop.f32.mrf.mxu2 }
  0xb9   :  { %v1177_v61 = vadd.f32 1.0, %v990_v58  ;;  %991 = vpow2.f32 %v832_v56  ;;  %v358_v51 = vpop.f32.mrf.mxu3 }
  0xba   :  { %993 = vrcp.f32 %v1174_v59  ;;  %v409_v17 = vand.u32 2147483647, %v1174_v59  ;;  %v411_v18 = vand.u32 2147483648, %v1174_v59  ;;  %vm405_vm1 = vweird.f32 %v1174_v59 }
  0xbb   :  { %995 = vrcp.f32 %v1177_v61  ;;  %v424_v24 = vand.u32 2147483647, %v1177_v61  ;;  %v426_v27 = vand.u32 2147483648, %v1177_v61  ;;  %vm420_vm2 = vweird.f32 %v1177_v61 }
  0xbc   :  { %997 = vpow2.f32 %v833_v60  ;;  %vm1219_vm4 = vcmp.eq.f32.partialorder %v409_v17, 8.507059e+37  ;;  %v412_v38 = vor.u32 1.1754944e-38, %v411_v18 }
  0xbd   :  { %vm1228_vm6 = vcmp.eq.f32.partialorder %v424_v24, 8.507059e+37  ;;  %v427_v42 = vor.u32 1.1754944e-38, %v426_v27 }
  0xbe   :  { %v1181_v2 = vpop.f32.mrf.mxu0 }
  0xbf   :  { %v992_v3 = vpop.eup %991  ;;  %v834_v4 = vmul.f32 -1.442695, %v1181_v2  ;;  %v1184_v5 = vpop.f32.mrf.mxu1 }
  0xc0   :  { %v994_v6 = vpop.eup %993  ;;  %v1186_v7 = vadd.f32 1.0, %v992_v3  ;;  %v835_v8 = vmul.f32 -1.442695, %v1184_v5  ;;  %v341_v1 = vpop.f32.mrf.mxu2 }
  0xc1   :  { %v1189_v9 = vpop.eup %995  ;;  %v401_v10 = vmul.f32 %v994_v6, %v1174_v59  ;;  %999 = vpow2.f32 %v834_v4  ;;  %vm406_vm0 = vweird.f32 %v994_v6 }
  0xc2   :  { %v998_v11 = vpop.eup %997  ;;  %v416_v12 = vmul.f32 %v1189_v9, %v1177_v61  ;;  %1001 = vrcp.f32 %v1186_v7  ;;  %v439_v28 = vand.u32 2147483647, %v1186_v7  ;;  %v441_v31 = vand.u32 2147483648, %v1186_v7  ;;  %vm1215_vm3 = vmor %vm405_vm1, %vm406_vm0 }
  0xc3   :  { %v402_v13 = vsub.f32 1.0, %v401_v10  ;;  %v1195_v14 = vadd.f32 1.0, %v998_v11  ;;  %1003 = vpow2.f32 %v835_v8  ;;  %vm421_vm5 = vweird.f32 %v1189_v9 }
  0xc4   :  { %v417_v15 = vsub.f32 1.0, %v416_v12  ;;  %vm435_vm7 = vweird.f32 %v1186_v7  ;;  %vm1235_vm8 = vcmp.eq.f32.partialorder %v439_v28, 8.507059e+37  ;;  %vm1242_vm9 = vmor %vm420_vm2, %vm421_vm5  ;;  %v442_v49 = vor.u32 1.1754944e-38, %v441_v31 }
  0xc5   :  { %v403_v16 = vmul.f32 %v994_v6, %v402_v13  ;;  %1005 = vrcp.f32 %v1195_v14  ;;  %v454_v60 = vand.u32 2147483647, %v1195_v14  ;;  %v456_v61 = vand.u32 2147483648, %v1195_v14 }
  0xc6   :  { %v418_v19 = vmul.f32 %v1189_v9, %v417_v15  ;;  %v1203_v21 = vpop.f32.mrf.mxu0  ;;  %vm450_vm13 = vweird.f32 %v1195_v14 }
  0xc7   :  { %v1000_v22 = vpop.eup %999  ;;  %v404_v23 = vadd.f32 %v994_v6, %v403_v16  ;;  %v836_v25 = vmul.f32 -1.442695, %v1203_v21  ;;  %v1232_v41 = vpop.f32.mrf.mxu1  ;;  %v457_v11 = vor.u32 1.1754944e-38, %v456_v61  ;;  %vm455_vm15 = vcmp.eq.f32.partialorder %v454_v60, 8.507059e+37 }
  0xc8   :  { %v1002_v26 = vpop.eup %1001  ;;  %v1210_v29 = vadd.f32 1.0, %v1000_v22  ;;  %v419_v35 = vadd.f32 %v1189_v9, %v418_v19  ;;  %v837_v56 = vmul.f32 -1.442695, %v1232_v41  ;;  %v344_v33 = vpop.f32.mrf.mxu2 }
  0xc9   :  { %v431_v30 = vmul.f32 %v1002_v26, %v1186_v7  ;;  %1007 = vpow2.f32 %v836_v25  ;;  %v1004_v32 = vpop.eup %1003  ;;  %v408_v37 = vsel %vm1215_vm3, %v994_v6, %v404_v23  ;;  %vm436_vm10 = vweird.f32 %v1002_v26  ;;  %v360_v25 = vpop.f32.mrf.mxu3 }
  0xca   :  { %1009 = vrcp.f32 %v1210_v29  ;;  %v1246_v50 = vadd.f32 1.0, %v1004_v32  ;;  %v413_v52 = vsel %vm1219_vm4, %v412_v38, %v408_v37  ;;  %v423_v53 = vsel %vm1242_vm9, %v1189_v9, %v419_v35  ;;  %vm437_vm11 = vmor %vm435_vm7, %vm436_vm10 }
  0xcb   :  { %v1006_v36 = vpop.eup %1005  ;;  %v432_v40 = vsub.f32 1.0, %v431_v30  ;;  %v520_v3 = vmul.f32 %v413_v52, %v1163_v46  ;;  %v428_v4 = vsel %vm1228_vm6, %v427_v42, %v423_v53  ;;  %vm465_vm1 = vweird.f32 %v1210_v29 }
  0xcc   :  { %v446_v44 = vmul.f32 %v1006_v36, %v1195_v14  ;;  %1011 = vrcp.f32 %v1246_v50  ;;  %vm451_vm12 = vweird.f32 %v1006_v36  ;;  %v521_v46 = vmul.f32 %v428_v4, %v1166_v48 }
  0xcd   :  { %v433_v47 = vmul.f32 %v1002_v26, %v432_v40  ;;  %1013 = vpow2.f32 %v837_v56  ;;  %vm452_vm14 = vmor %vm450_vm13, %vm451_vm12  ;;  %v528_v18 = vmul.f32 %v520_v3, %v1201_v20  ;;  %v471_v27 = vand.u32 2147483648, %v1210_v29 }
  0xce   :  { %v447_v55 = vsub.f32 1.0, %v446_v44  ;;  %v469_v30 = vand.u32 2147483647, %v1210_v29  ;;  %v529_v31 = vmul.f32 %v521_v46, %v358_v51  ;;  %v486_v44 = vand.u32 2147483648, %v1246_v50 }
  0xcf   :  { %v1008_v58 = vpop.eup %1007  ;;  %v434_v59 = vadd.f32 %v1002_v26, %v433_v47  ;;  %v472_v37 = vor.u32 1.1754944e-38, %v471_v27  ;;  %vm480_vm7 = vweird.f32 %v1246_v50  ;;  %v484_v47 = vand.u32 2147483647, %v1246_v50 }
  0xd0   :  { %v1010_v62 = vpop.eup %1009  ;;  %v448_v63 = vmul.f32 %v1006_v36, %v447_v55  ;;  %v1259_v0 = vadd.f32 1.0, %v1008_v58  ;;  %vm470_vm3 = vcmp.eq.f32.partialorder %v469_v30, 8.507059e+37 }
  0xd1   :  { %v438_v6 = vsel %vm437_vm11, %v1002_v26, %v434_v59  ;;  %v461_v8 = vmul.f32 %v1010_v62, %v1210_v29  ;;  %vm466_vm0 = vweird.f32 %v1010_v62  ;;  %v363_v56 = vpop.f32.mrf.mxu3  ;;  %vm485_vm11 = vcmp.eq.f32.partialorder %v484_v47, 8.507059e+37 }
  0xd2   :  { %v443_v9 = vsel %vm1235_vm8, %v442_v49, %v438_v6  ;;  %v449_v10 = vadd.f32 %v1006_v36, %v448_v63  ;;  %1015 = vrcp.f32 %v1259_v0  ;;  %v1271_v15 = vpop.eup %1011  ;;  %vm467_vm2 = vmor %vm465_vm1, %vm466_vm0  ;;  %v501_v38 = vand.u32 2147483648, %v1259_v0 }
  0xd3   :  { %v522_v7 = vmul.f32 %v443_v9, %v1169_v54  ;;  %v462_v12 = vsub.f32 1.0, %v461_v8  ;;  %v1014_v22 = vpop.eup %1013  ;;  %v476_v54 = vmul.f32 %v1271_v15, %v1246_v50  ;;  %v499_v29 = vand.u32 2147483647, %v1259_v0 }
  0xd4   :  { %v453_v13 = vsel %vm452_vm14, %v1006_v36, %v449_v10  ;;  %v1277_v24 = vadd.f32 1.0, %v1014_v22  ;;  %vm481_vm5 = vweird.f32 %v1271_v15  ;;  %vm495_vm6 = vweird.f32 %v1259_v0 }
  0xd5   :  { %v458_v16 = vsel %vm455_vm15, %v457_v11, %v453_v13  ;;  %v463_v17 = vmul.f32 %v1010_v62, %v462_v12  ;;  %v530_v19 = vmul.f32 %v522_v7, %v341_v1  ;;  %v477_v28 = vsub.f32 1.0, %v476_v54  ;;  %vm1295_vm9 = vmor %vm480_vm7, %vm481_vm5 }
  0xd6   :  { %v523_v14 = vmul.f32 %v458_v16, %v1172_v57  ;;  %1017 = vrcp.f32 %v1277_v24  ;;  %v502_v49 = vor.u32 1.1754944e-38, %v501_v38  ;;  %vm500_vm10 = vcmp.eq.f32.partialorder %v499_v29, 8.507059e+37 }
  0xd7   :  { %v464_v23 = vadd.f32 %v1010_v62, %v463_v17  ;;  %v536_v48 = vpack.c.bf16 %v530_v19, %v528_v18  ;;  %v478_v32 = vmul.f32 %v1271_v15, %v477_v28  ;;  %v487_v50 = vor.u32 1.1754944e-38, %v486_v44 }
  0xd8   :  { %v1016_v26 = vpop.eup %1015  ;;  %v531_v20 = vmul.f32 %v523_v14, %v360_v25  ;;  %v514_v63 = vand.u32 2147483647, %v1277_v24  ;;  %vm510_vm13 = vweird.f32 %v1277_v24 }
  0xd9   :  { %v491_v57 = vmul.f32 %v1016_v26, %v1259_v0  ;;  %644 = vmatmul.bf16.vlgmr.msrb.gmra.mxu0 %v536_v48  ;;  %v468_v34 = vsel %vm467_vm2, %v1010_v62, %v464_v23  ;;  %vm496_vm4 = vweird.f32 %v1016_v26  ;;  %v479_v42 = vadd.f32 %v1271_v15, %v478_v32  ;;  %v346_v0 = vpop.f32.mrf.mxu2  ;;  %v365_v12 = vpop.f32.mrf.mxu3 }
  0xda   :  { %v537_v36 = vpack.c.bf16 %v531_v20, %v529_v31  ;;  %v473_v40 = vsel %vm470_vm3, %v472_v37, %v468_v34  ;;  %vm497_vm8 = vmor %vm495_vm6, %vm496_vm4  ;;  %v516_v62 = vand.u32 2147483648, %v1277_v24  ;;  %vm515_vm15 = vcmp.eq.f32.partialorder %v514_v63, 8.507059e+37 }
  0xdb   :  { %v492_v35 = vsub.f32 1.0, %v491_v57  ;;  %v524_v52 = vmul.f32 %v473_v40, %v1181_v2  ;;  %v483_v58 = vsel %vm1295_vm9, %v1271_v15, %v479_v42 }
  0xdc   :  { %663 = vmatmul.bf16.vlgmr.msrb.gmra.mxu1 %v537_v36  ;;  %v1018_v43 = vpop.eup %1017  ;;  %v488_v1 = vsel %vm485_vm11, %v487_v50, %v483_v58  ;;  %v517_v8 = vor.u32 1.1754944e-38, %v516_v62 }
  0xdd   :  { %v493_v39 = vmul.f32 %v1016_v26, %v492_v35  ;;  %v506_v51 = vmul.f32 %v1018_v43, %v1277_v24  ;;  %vm511_vm12 = vweird.f32 %v1018_v43  ;;  %v532_v3 = vmul.f32 %v524_v52, %v344_v33 }
  0xde   :  { %vm512_vm14 = vmor %vm510_vm13, %vm511_vm12  ;;  %v525_v10 = vmul.f32 %v488_v1, %v1184_v5 }
  0xdf   :  { %v494_v45 = vadd.f32 %v1016_v26, %v493_v39  ;;  %v507_v60 = vsub.f32 1.0, %v506_v51 }
  0xe0   :  { %v533_v46 = vmul.f32 %v525_v10, %v363_v56 }
  0xe1   :  { %v498_v55 = vsel %vm497_vm8, %v1016_v26, %v494_v45  ;;  %v508_v2 = vmul.f32 %v1018_v43, %v507_v60 }
  0xe2   :  { %v503_v59 = vsel %vm500_vm10, %v502_v49, %v498_v55 }
  0xe3   :  { %v526_v61 = vmul.f32 %v503_v59, %v1203_v21  ;;  %v509_v6 = vadd.f32 %v1018_v43, %v508_v2 }
  0xe5   :  { %v534_v4 = vmul.f32 %v526_v61, %v346_v0  ;;  %v513_v21 = vsel %vm512_vm14, %v1018_v43, %v509_v6 }
  0xe6   :  { %v518_v7 = vsel %vm515_vm15, %v517_v8, %v513_v21 }
  0xe7   :  { %v538_v9 = vpack.c.bf16 %v534_v4, %v532_v3  ;;  %v527_v11 = vmul.f32 %v518_v7, %v1232_v41 }
  0xe9   :  { %649 = vmatmul.bf16.vlgmr.msrb.gmra.mxu2 %v538_v9  ;;  %v535_v13 = vmul.f32 %v527_v11, %v365_v12 }
  0xeb   :  { %v539_v15 = vpack.c.bf16 %v535_v13, %v533_v46 }
  0xed   :  { %668 = vmatmul.bf16.vlgmr.msrb.gmra.mxu3 %v539_v15 }
 0x156   :  { %v645_v16 = vpop.f32.mrf.mxu0 }
 0x159   :  { %v664_v17 = vpop.f32.mrf.mxu1 }
 0x15a   :  { %v665_v22 = vadd.f32 %v664_v17, %v645_v16 }
 0x15e   :  { %v647_v18 = vpop.f32.mrf.mxu0 }
 0x161   :  { %v666_v19 = vpop.f32.mrf.mxu1 }
 0x162   :  { %v667_v14 = vadd.f32 %v666_v19, %v647_v18 }
 0x164   :  { %v953_v54 = vpack.c.bf16 %v667_v14, %v665_v22 }
 0x166   :  { %954 = vst [vmem:[#allocation8] sm:$0xff] %v953_v54  }
 0x16c   :  { %v650_v5 = vpop.f32.mrf.mxu2 }
 0x170   :  { %v669_v23 = vpop.f32.mrf.mxu3 }
 0x171   :  { %v670_v41 = vadd.f32 %v669_v23, %v650_v5 }
 0x174   :  { %v652_v24 = vpop.f32.mrf.mxu2 }
 0x178   :  { %v671_v48 = vpop.f32.mrf.mxu3 }
 0x179   :  { %v672_v25 = vadd.f32 %v671_v48, %v652_v24 }
 0x17b   :  { %v958_v26 = vpack.c.bf16 %v672_v25, %v670_v41 }
 0x17d   :  { %960 = vst [vmem:[#allocation8 + $0x8] sm:$0xff] %v958_v26  }
 0x17e   :  { %694 = dma.vmem_to_hbm [thread:$0]  %s687_s4, 256, %s689_s7, [#allocation4], %s1128_s30, %s1128_s30, %s1129_s0  }
 0x17f   :  { %1119 = dma.done.wait [#allocation4], 256  }
 0x180   :  { %1120 = vsyncadd [#allocation4], 4294967040 }
 0x181   :  { %699 = vsyncpa [#allocation3], 1 }
 0x182   :  { %700 = vsyncpa [#allocation6], 1 }
 0x183   :  { %701 = vsyncpa [#allocation4], 1 }

</bundles_post_ra>
